<compile_context>
chip_gen: v6e
topology: v6e:2x2x1
jax: 0.10.0
libtpu: 0.0.40
codegen_flags: <defaults>
</compile_context>

<pallas_src>
import jax
import jax.numpy as jnp
from jax.experimental import pallas as pl
from jax.experimental.pallas import tpu as pltpu

# ---------------- model hyper-parameters (small, synthetic) ----------------
B = 2                               # batch
C_IN = 3                            # input channels
H = W = 32                          # spatial size
PATCH = 8                           # conv kernel == stride
T = (H // PATCH) * (W // PATCH)     # 16 tokens
D = 32                              # hidden dim
Q = 8                               # number of object queries
F = 64                              # FFN dim
NUM_CLASSES = 4
NUM_PTS = 16                        # contour points per query -> 2*NUM_PTS coords

K_RAW = PATCH * PATCH * C_IN        # 192  (im2col width)
K_PAD = 256                         # lane-aligned padded K
HEAD_N = 2 * NUM_PTS + NUM_CLASSES  # 36   fused head width: [pts(32) | cls(4)]
OUT_LANES = 128                     # lane-dense output slab width
SCORE_COL = 2 * NUM_PTS             # 32
LABEL_COL = SCORE_COL + 1           # 33


# ============================ fused Pallas kernel ============================

def _fused_kernel(orig_ref,                 # SMEM (B, 2) int32  (w, h) -- scalar prefetch
                  patches_ref,              # (1, T, K_PAD)
                  pe_w_ref, pe_b_ref,       # (K_PAD, D), (1, D)
                  qemb_ref,                 # (Q, D)
                  wqkv_ref,                 # (D, 3D)    [wq | wk | wv]
                  wo_ref,                   # (D, D)
                  w1_ref, b1_ref,           # (D, F), (1, F)
                  w2_ref, b2_ref,           # (F, D), (1, D)
                  head_w_ref, head_b_ref,   # (D, HEAD_N), (1, HEAD_N)  [pts | cls]
                  out_ref):                 # (1, Q, OUT_LANES)
    b = pl.program_id(0)

    # ---- patch embedding (im2col already done in wrapper; zero-padded K) ----
    tok = jnp.dot(patches_ref[0], pe_w_ref[...],
                  preferred_element_type=jnp.float32) + pe_b_ref[...]        # (T, D)

    # ---- fused QKV projection: one matmul over stacked [qemb; tok] rows ----
    qemb = qemb_ref[...]                                                     # (Q, D)
    x = jnp.concatenate([qemb, tok], axis=0)                                 # (Q+T, D)
    qkv = jnp.dot(x, wqkv_ref[...], preferred_element_type=jnp.float32)      # (Q+T, 3D)
    scale = 1.0 / (D ** 0.5)
    q = qkv[:Q, 0:D] * scale                                                 # (Q, D)
    k = qkv[Q:Q + T, D:2 * D]                                                # (T, D)
    v = qkv[Q:Q + T, 2 * D:3 * D]                                            # (T, D)

    # ---- single-head cross-attention (numerically-stable softmax) ----
    s = jnp.einsum('qd,kd->qk', q, k, preferred_element_type=jnp.float32)    # (Q, T)
    s = s - jnp.max(s, axis=-1, keepdims=True)
    p = jnp.exp(s)
    p = p * pl.reciprocal(jnp.sum(p, axis=-1, keepdims=True), approx=True)

    ctx = jnp.dot(p, v, preferred_element_type=jnp.float32)                  # (Q, D)
    h = qemb + jnp.dot(ctx, wo_ref[...], preferred_element_type=jnp.float32)

    ffn = jnp.maximum(
        jnp.dot(h, w1_ref[...], preferred_element_type=jnp.float32) + b1_ref[...], 0.0)
    ffn = jnp.dot(ffn, w2_ref[...], preferred_element_type=jnp.float32) + b2_ref[...]
    dec = h + ffn                                                            # (Q, D)

    # ---- fused prediction heads: contour points (32) + class logits (4) ----
    head = jnp.dot(dec, head_w_ref[...],
                   preferred_element_type=jnp.float32) + head_b_ref[...]     # (Q, 36)
    coords = head[:, :2 * NUM_PTS]                                           # (Q, 32)
    logits = head[:, 2 * NUM_PTS:HEAD_N]                                     # (Q, 4)

    # ---- postprocess: sigmoid scores, per-query label, scale contour pts ----
    prob = jax.nn.sigmoid(logits)
    max_p = jnp.max(prob, axis=-1, keepdims=True)                            # (Q, 1)
    cls_idx = jax.lax.broadcasted_iota(jnp.int32, prob.shape, 1)
    labels = jnp.min(jnp.where(prob >= max_p, cls_idx, NUM_CLASSES),
                     axis=-1, keepdims=True).astype(jnp.float32)             # (Q, 1)

    pts = jax.nn.sigmoid(coords)                                             # (Q, 32) in [0,1]
    ow = orig_ref[b, 0].astype(jnp.float32)
    oh = orig_ref[b, 1].astype(jnp.float32)
    lane = jax.lax.broadcasted_iota(jnp.int32, pts.shape, 1)
    pts = pts * jnp.where(lane % 2 == 0, ow, oh)       # interleaved (x, y, x, y, ...)

    # ---- single lane-dense output slab: [pts(32) | score(1) | label(1) | pad(94)] ----
    pad = jnp.zeros((Q, OUT_LANES - LABEL_COL - 1), jnp.float32)
    out_ref[0] = jnp.concatenate([pts, max_p, labels, pad], axis=-1)         # (Q, 128)


# ============================ parameter setup ===============================

def init_params(seed=0):
    keys = jax.random.split(jax.random.PRNGKey(seed), 16)
    n = lambda k, shape: (jax.random.normal(k, shape, jnp.float32) * 0.02)
    pe_w = jnp.pad(n(keys[0], (K_RAW, D)), ((0, K_PAD - K_RAW), (0, 0)))   # zero-pad K
    wq, wk, wv = n(keys[2], (D, D)), n(keys[3], (D, D)), n(keys[4], (D, D))
    cls_w = n(keys[8], (D, NUM_CLASSES))
    pts_w = n(keys[9], (D, 2 * NUM_PTS))
    return {
        "pe_w": pe_w,                                   # (K_PAD, D)
        "pe_b": jnp.zeros((1, D), jnp.float32),
        "q_emb": n(keys[1], (Q, D)),
        "wqkv": jnp.concatenate([wq, wk, wv], axis=1),  # (D, 3D)
        "wo": n(keys[5], (D, D)),
        "w1": n(keys[6], (D, F)),
        "b1": jnp.zeros((1, F), jnp.float32),
        "w2": n(keys[7], (F, D)),
        "b2": jnp.zeros((1, D), jnp.float32),
        "head_w": jnp.concatenate([pts_w, cls_w], axis=1),   # (D, 36): pts then cls
        "head_b": jnp.zeros((1, HEAD_N), jnp.float32),
    }


# ============================ forward (wrapper) =============================

@jax.jit
def contourformer_forward(images, orig_target_sizes, params):
    """images: (B, C, H, W) NCHW f32; orig_target_sizes: (B, 2) f32 (w, h)."""
    Bn = images.shape[0]
    # mirror torch wrapper: input_sizes = [[W, H]]
    input_sizes = jnp.array([[images.shape[-1], images.shape[-2]]], jnp.float32)
    # TODO(synk): the reference postprocessor's exact use of input_sizes (ratio rescale /
    # clamp) is config-dependent; coords here are sigmoid-normalized and scaled by orig sizes.
    del input_sizes

    # im2col for the k=s=PATCH patch-embed conv (tiny data prep, stays in XLA).
    x = jnp.transpose(images, (0, 2, 3, 1))                              # NHWC
    x = x.reshape(Bn, H // PATCH, PATCH, W // PATCH, PATCH, C_IN)
    x = jnp.transpose(x, (0, 1, 3, 2, 4, 5))                             # (B, h, w, p, p, C)
    patches = x.reshape(Bn, T, K_RAW)
    patches = jnp.pad(patches, ((0, 0), (0, 0), (0, K_PAD - K_RAW)))     # lane-align K

    # orig sizes as SMEM scalars (int32) via scalar prefetch.
    orig_i32 = jnp.round(orig_target_sizes).astype(jnp.int32)            # (B, 2) (w, h)

    grid_spec = pltpu.PrefetchScalarGridSpec(
        num_scalar_prefetch=1,
        grid=(Bn,),
        in_specs=[
            pl.BlockSpec((1, T, K_PAD), lambda b, orig: (b, 0, 0)),
            pl.BlockSpec((K_PAD, D), lambda b, orig: (0, 0)),
            pl.BlockSpec((1, D), lambda b, orig: (0, 0)),
            pl.BlockSpec((Q, D), lambda b, orig: (0, 0)),
            pl.BlockSpec((D, 3 * D), lambda b, orig: (0, 0)),
            pl.BlockSpec((D, D), lambda b, orig: (0, 0)),
            pl.BlockSpec((D, F), lambda b, orig: (0, 0)),
            pl.BlockSpec((1, F), lambda b, orig: (0, 0)),
            pl.BlockSpec((F, D), lambda b, orig: (0, 0)),
            pl.BlockSpec((1, D), lambda b, orig: (0, 0)),
            pl.BlockSpec((D, HEAD_N), lambda b, orig: (0, 0)),
            pl.BlockSpec((1, HEAD_N), lambda b, orig: (0, 0)),
        ],
        out_specs=pl.BlockSpec((1, Q, OUT_LANES), lambda b, orig: (b, 0, 0)),
    )

    slab = pl.pallas_call(
        _fused_kernel,
        out_shape=jax.ShapeDtypeStruct((Bn, Q, OUT_LANES), jnp.float32),
        grid_spec=grid_spec,
        compiler_params=pltpu.CompilerParams(
            dimension_semantics=("parallel",)),    # v7x: one image per TensorCore
    )(orig_i32, patches,
      params["pe_w"], params["pe_b"], params["q_emb"], params["wqkv"],
      params["wo"], params["w1"], params["b1"], params["w2"], params["b2"],
      params["head_w"], params["head_b"])

    # unpack the lane-dense slab
    scores = slab[:, :, SCORE_COL]
    labels = slab[:, :, LABEL_COL].astype(jnp.int32)
    contours = slab[:, :, :2 * NUM_PTS].reshape(Bn, Q, NUM_PTS, 2)
    return {"scores": scores, "labels": labels, "contours": contours}


# ================================= main =====================================

if __name__ == "__main__":
    key = jax.random.PRNGKey(0)
    images = jax.random.normal(key, (B, C_IN, H, W), jnp.float32)
    orig_target_sizes = jnp.array([[640.0, 480.0], [800.0, 600.0]], jnp.float32)  # (w, h)

    params = init_params(seed=0)
    out = contourformer_forward(images, orig_target_sizes, params)
    out = jax.block_until_ready(out)

    assert out["scores"].shape == (B, Q)
    assert out["labels"].shape == (B, Q) and out["labels"].dtype == jnp.int32
    assert out["contours"].shape == (B, Q, NUM_PTS, 2)
    assert bool(jnp.all(jnp.isfinite(out["scores"])))
    assert bool(jnp.all(jnp.isfinite(out["contours"])))
    assert bool(jnp.all((out["labels"] >= 0) & (out["labels"] < NUM_CLASSES)))
    print("KERNEL_OK")
</pallas_src>

<mosaic_0001>
module attributes {stable_mosaic.version = 11 : i64} {
  func.func @_fused_kernel(%arg0: i32, %arg1: memref<2x2xi32, #tpu.memory_space<smem>>, %arg2: memref<1x16x256xf32, #tpu.memory_space<vmem>>, %arg3: memref<256x32xf32, #tpu.memory_space<vmem>>, %arg4: memref<1x32xf32, #tpu.memory_space<vmem>>, %arg5: memref<8x32xf32, #tpu.memory_space<vmem>>, %arg6: memref<32x96xf32, #tpu.memory_space<vmem>>, %arg7: memref<32x32xf32, #tpu.memory_space<vmem>>, %arg8: memref<32x64xf32, #tpu.memory_space<vmem>>, %arg9: memref<1x64xf32, #tpu.memory_space<vmem>>, %arg10: memref<64x32xf32, #tpu.memory_space<vmem>>, %arg11: memref<1x32xf32, #tpu.memory_space<vmem>>, %arg12: memref<32x36xf32, #tpu.memory_space<vmem>>, %arg13: memref<1x36xf32, #tpu.memory_space<vmem>>, %arg14: memref<1x8x128xf32, #tpu.memory_space<vmem>>) attributes {dimension_semantics = [#tpu.dimension_semantics<parallel>], iteration_bounds = array<i64: 2>, scalar_prefetch = 1 : i64, scratch_operands = 0 : i64, tpu.core_type = #tpu.core_type<tc>, window_params = [{transform_indices = @transform_0, window_bounds = array<i64: 1, 16, 256>}, {pipeline_mode = #tpu.pipeline_mode<synchronous>, transform_indices = @transform_1, window_bounds = array<i64: 256, 32>}, {pipeline_mode = #tpu.pipeline_mode<synchronous>, transform_indices = @transform_2, window_bounds = array<i64: 1, 32>}, {pipeline_mode = #tpu.pipeline_mode<synchronous>, transform_indices = @transform_3, window_bounds = array<i64: 8, 32>}, {pipeline_mode = #tpu.pipeline_mode<synchronous>, transform_indices = @transform_4, window_bounds = array<i64: 32, 96>}, {pipeline_mode = #tpu.pipeline_mode<synchronous>, transform_indices = @transform_5, window_bounds = array<i64: 32, 32>}, {pipeline_mode = #tpu.pipeline_mode<synchronous>, transform_indices = @transform_6, window_bounds = array<i64: 32, 64>}, {pipeline_mode = #tpu.pipeline_mode<synchronous>, transform_indices = @transform_7, window_bounds = array<i64: 1, 64>}, {pipeline_mode = #tpu.pipeline_mode<synchronous>, transform_indices = @transform_8, window_bounds = array<i64: 64, 32>}, {pipeline_mode = #tpu.pipeline_mode<synchronous>, transform_indices = @transform_9, window_bounds = array<i64: 1, 32>}, {pipeline_mode = #tpu.pipeline_mode<synchronous>, transform_indices = @transform_10, window_bounds = array<i64: 32, 36>}, {pipeline_mode = #tpu.pipeline_mode<synchronous>, transform_indices = @transform_11, window_bounds = array<i64: 1, 36>}, {transform_indices = @transform_12, window_bounds = array<i64: 1, 8, 128>}]} {
    %c0 = arith.constant 0 : index
    %c0_0 = arith.constant 0 : index
    %c0_1 = arith.constant 0 : index
    %0 = vector.load %arg2[%c0, %c0_0, %c0_1] : memref<1x16x256xf32, #tpu.memory_space<vmem>>, vector<1x16x256xf32>
    %1 = vector.shape_cast %0 : vector<1x16x256xf32> to vector<16x256xf32>
    %c0_2 = arith.constant 0 : index
    %c0_3 = arith.constant 0 : index
    %2 = vector.load %arg3[%c0_2, %c0_3] : memref<256x32xf32, #tpu.memory_space<vmem>>, vector<256x32xf32>
    %cst = arith.constant dense<0.000000e+00> : vector<16x32xf32>
    %3 = tpu.matmul %1, %2, %cst {dimension_numbers = #tpu.dot_dimension_numbers<[1], [0], [0], [1], [0, 0, 1, 1], [], []>} : vector<16x256xf32>, vector<256x32xf32>, vector<16x32xf32> -> vector<16x32xf32>
    %c0_4 = arith.constant 0 : index
    %c0_5 = arith.constant 0 : index
    %4 = vector.load %arg4[%c0_4, %c0_5] : memref<1x32xf32, #tpu.memory_space<vmem>>, vector<1x32xf32>
    %5 = vector.broadcast %4 : vector<1x32xf32> to vector<16x32xf32>
    %6 = arith.addf %3, %5 : vector<16x32xf32>
    %c0_6 = arith.constant 0 : index
    %c0_7 = arith.constant 0 : index
    %7 = vector.load %arg5[%c0_6, %c0_7] : memref<8x32xf32, #tpu.memory_space<vmem>>, vector<8x32xf32>
    %8 = tpu.concatenate %7, %6 in 0 : vector<8x32xf32>, vector<16x32xf32> -> vector<24x32xf32>
    %c0_8 = arith.constant 0 : index
    %c0_9 = arith.constant 0 : index
    %9 = vector.load %arg6[%c0_8, %c0_9] : memref<32x96xf32, #tpu.memory_space<vmem>>, vector<32x96xf32>
    %cst_10 = arith.constant dense<0.000000e+00> : vector<24x96xf32>
    %10 = tpu.matmul %8, %9, %cst_10 {dimension_numbers = #tpu.dot_dimension_numbers<[1], [0], [0], [1], [0, 0, 1, 1], [], []>} : vector<24x32xf32>, vector<32x96xf32>, vector<24x96xf32> -> vector<24x96xf32>
    %11 = vector.extract_strided_slice %10 {offsets = [0, 0], sizes = [8, 32], strides = [1, 1]} : vector<24x96xf32> to vector<8x32xf32>
    %cst_11 = arith.constant 0.176776692 : f32
    %12 = vector.broadcast %cst_11 : f32 to vector<8x32xf32>
    %13 = arith.mulf %11, %12 : vector<8x32xf32>
    %14 = vector.extract_strided_slice %10 {offsets = [8, 32], sizes = [16, 32], strides = [1, 1]} : vector<24x96xf32> to vector<16x32xf32>
    %15 = vector.extract_strided_slice %10 {offsets = [8, 64], sizes = [16, 32], strides = [1, 1]} : vector<24x96xf32> to vector<16x32xf32>
    "tpu.trace_start"() <{level = 10 : i32, message = "qd,kd->qk"}> : () -> ()
    %cst_12 = arith.constant dense<0.000000e+00> : vector<8x16xf32>
    %16 = tpu.matmul %13, %14, %cst_12 {dimension_numbers = #tpu.dot_dimension_numbers<[1], [1], [0], [0], [0, 0, 1, 0], [], []>} : vector<8x32xf32>, vector<16x32xf32>, vector<8x16xf32> -> vector<8x16xf32>
    "tpu.trace_stop"() : () -> ()
    %cst_13 = arith.constant dense<0xFF800000> : vector<8xf32>
    %17 = vector.multi_reduction <maximumf>, %16, %cst_13 [1] : vector<8x16xf32> to vector<8xf32>
    %18 = vector.shape_cast %17 : vector<8xf32> to vector<8x1xf32>
    %19 = vector.broadcast %18 : vector<8x1xf32> to vector<8x16xf32>
    %20 = arith.subf %16, %19 : vector<8x16xf32>
    %21 = math.exp %20 : vector<8x16xf32>
    %cst_14 = arith.constant dense<0.000000e+00> : vector<8xf32>
    %22 = vector.multi_reduction <add>, %21, %cst_14 [1] : vector<8x16xf32> to vector<8xf32>
    %23 = vector.shape_cast %22 : vector<8xf32> to vector<8x1xf32>
    %24 = tpu.reciprocal %23 {approx = true} : vector<8x1xf32> -> vector<8x1xf32>
    %25 = vector.broadcast %24 : vector<8x1xf32> to vector<8x16xf32>
    %26 = arith.mulf %21, %25 : vector<8x16xf32>
    %cst_15 = arith.constant dense<0.000000e+00> : vector<8x32xf32>
    %27 = tpu.matmul %26, %15, %cst_15 {dimension_numbers = #tpu.dot_dimension_numbers<[1], [0], [0], [1], [0, 0, 1, 1], [], []>} : vector<8x16xf32>, vector<16x32xf32>, vector<8x32xf32> -> vector<8x32xf32>
    %c0_16 = arith.constant 0 : index
    %c0_17 = arith.constant 0 : index
    %28 = vector.load %arg7[%c0_16, %c0_17] : memref<32x32xf32, #tpu.memory_space<vmem>>, vector<32x32xf32>
    %cst_18 = arith.constant dense<0.000000e+00> : vector<8x32xf32>
    %29 = tpu.matmul %27, %28, %cst_18 {dimension_numbers = #tpu.dot_dimension_numbers<[1], [0], [0], [1], [0, 0, 1, 1], [], []>} : vector<8x32xf32>, vector<32x32xf32>, vector<8x32xf32> -> vector<8x32xf32>
    %30 = arith.addf %7, %29 : vector<8x32xf32>
    %c0_19 = arith.constant 0 : index
    %c0_20 = arith.constant 0 : index
    %31 = vector.load %arg8[%c0_19, %c0_20] : memref<32x64xf32, #tpu.memory_space<vmem>>, vector<32x64xf32>
    %cst_21 = arith.constant dense<0.000000e+00> : vector<8x64xf32>
    %32 = tpu.matmul %30, %31, %cst_21 {dimension_numbers = #tpu.dot_dimension_numbers<[1], [0], [0], [1], [0, 0, 1, 1], [], []>} : vector<8x32xf32>, vector<32x64xf32>, vector<8x64xf32> -> vector<8x64xf32>
    %c0_22 = arith.constant 0 : index
    %c0_23 = arith.constant 0 : index
    %33 = vector.load %arg9[%c0_22, %c0_23] : memref<1x64xf32, #tpu.memory_space<vmem>>, vector<1x64xf32>
    %34 = vector.broadcast %33 : vector<1x64xf32> to vector<8x64xf32>
    %35 = arith.addf %32, %34 : vector<8x64xf32>
    %cst_24 = arith.constant 0.000000e+00 : f32
    %36 = vector.broadcast %cst_24 : f32 to vector<8x64xf32>
    %37 = arith.maximumf %35, %36 : vector<8x64xf32>
    %c0_25 = arith.constant 0 : index
    %c0_26 = arith.constant 0 : index
    %38 = vector.load %arg10[%c0_25, %c0_26] : memref<64x32xf32, #tpu.memory_space<vmem>>, vector<64x32xf32>
    %cst_27 = arith.constant dense<0.000000e+00> : vector<8x32xf32>
    %39 = tpu.matmul %37, %38, %cst_27 {dimension_numbers = #tpu.dot_dimension_numbers<[1], [0], [0], [1], [0, 0, 1, 1], [], []>} : vector<8x64xf32>, vector<64x32xf32>, vector<8x32xf32> -> vector<8x32xf32>
    %c0_28 = arith.constant 0 : index
    %c0_29 = arith.constant 0 : index
    %40 = vector.load %arg11[%c0_28, %c0_29] : memref<1x32xf32, #tpu.memory_space<vmem>>, vector<1x32xf32>
    %41 = vector.broadcast %40 : vector<1x32xf32> to vector<8x32xf32>
    %42 = arith.addf %39, %41 : vector<8x32xf32>
    %43 = arith.addf %30, %42 : vector<8x32xf32>
    %c0_30 = arith.constant 0 : index
    %c0_31 = arith.constant 0 : index
    %44 = vector.load %arg12[%c0_30, %c0_31] : memref<32x36xf32, #tpu.memory_space<vmem>>, vector<32x36xf32>
    %cst_32 = arith.constant dense<0.000000e+00> : vector<8x36xf32>
    %45 = tpu.matmul %43, %44, %cst_32 {dimension_numbers = #tpu.dot_dimension_numbers<[1], [0], [0], [1], [0, 0, 1, 1], [], []>} : vector<8x32xf32>, vector<32x36xf32>, vector<8x36xf32> -> vector<8x36xf32>
    %c0_33 = arith.constant 0 : index
    %c0_34 = arith.constant 0 : index
    %46 = vector.load %arg13[%c0_33, %c0_34] : memref<1x36xf32, #tpu.memory_space<vmem>>, vector<1x36xf32>
    %47 = vector.broadcast %46 : vector<1x36xf32> to vector<8x36xf32>
    %48 = arith.addf %45, %47 : vector<8x36xf32>
    %49 = vector.extract_strided_slice %48 {offsets = [0, 0], sizes = [8, 32], strides = [1, 1]} : vector<8x36xf32> to vector<8x32xf32>
    %50 = vector.extract_strided_slice %48 {offsets = [0, 32], sizes = [8, 4], strides = [1, 1]} : vector<8x36xf32> to vector<8x4xf32>
    %51 = arith.negf %50 : vector<8x4xf32>
    %52 = math.exp %51 : vector<8x4xf32>
    %cst_35 = arith.constant 1.000000e+00 : f32
    %53 = vector.broadcast %cst_35 : f32 to vector<8x4xf32>
    %54 = arith.addf %53, %52 : vector<8x4xf32>
    %55 = arith.divf %53, %54 : vector<8x4xf32>
    %cst_36 = arith.constant dense<0xFF800000> : vector<8xf32>
    %56 = vector.multi_reduction <maximumf>, %55, %cst_36 [1] : vector<8x4xf32> to vector<8xf32>
    %57 = vector.shape_cast %56 : vector<8xf32> to vector<8x1xf32>
    %58 = tpu.iota {dimensions = array<i32: 1>} : vector<8x4xi32>
    %59 = vector.broadcast %57 : vector<8x1xf32> to vector<8x4xf32>
    %60 = arith.cmpf oge, %55, %59 : vector<8x4xf32>
    %c4_i32 = arith.constant 4 : i32
    %61 = vector.broadcast %c4_i32 : i32 to vector<8x4xi32>
    %62 = arith.select %60, %58, %61 : vector<8x4xi1>, vector<8x4xi32>
    %cst_37 = arith.constant dense<2147483647> : vector<8xi32>
    %63 = vector.multi_reduction <minsi>, %62, %cst_37 [1] : vector<8x4xi32> to vector<8xi32>
    %64 = vector.shape_cast %63 : vector<8xi32> to vector<8x1xi32>
    %65 = arith.sitofp %64 : vector<8x1xi32> to vector<8x1xf32>
    %66 = arith.negf %49 : vector<8x32xf32>
    %67 = math.exp %66 : vector<8x32xf32>
    %cst_38 = arith.constant 1.000000e+00 : f32
    %68 = vector.broadcast %cst_38 : f32 to vector<8x32xf32>
    %69 = arith.addf %68, %67 : vector<8x32xf32>
    %70 = arith.divf %68, %69 : vector<8x32xf32>
    %71 = arith.index_cast %arg0 : i32 to index
    %c0_39 = arith.constant 0 : index
    %72 = memref.load %arg1[%71, %c0_39] : memref<2x2xi32, #tpu.memory_space<smem>>
    %73 = arith.sitofp %72 : i32 to f32
    %74 = arith.index_cast %arg0 : i32 to index
    %c1 = arith.constant 1 : index
    %75 = memref.load %arg1[%74, %c1] : memref<2x2xi32, #tpu.memory_space<smem>>
    %76 = arith.sitofp %75 : i32 to f32
    %77 = tpu.iota {dimensions = array<i32: 1>} : vector<8x32xi32>
    %c2_i32 = arith.constant 2 : i32
    %c0_i32 = arith.constant 0 : i32
    %78 = arith.cmpi eq, %c2_i32, %c0_i32 : i32
    %c1_i32 = arith.constant 1 : i32
    %79 = arith.select %78, %c1_i32, %c2_i32 : i32
    %80 = vector.broadcast %79 : i32 to vector<8x32xi32>
    %81 = arith.remsi %77, %80 : vector<8x32xi32>
    %c0_i32_40 = arith.constant 0 : i32
    %82 = vector.broadcast %c0_i32_40 : i32 to vector<8x32xi32>
    %83 = arith.cmpi ne, %81, %82 : vector<8x32xi32>
    %c0_i32_41 = arith.constant 0 : i32
    %84 = vector.broadcast %c0_i32_41 : i32 to vector<8x32xi32>
    %85 = arith.cmpi slt, %81, %84 : vector<8x32xi32>
    %c0_i32_42 = arith.constant 0 : i32
    %86 = arith.cmpi slt, %79, %c0_i32_42 : i32
    %87 = vector.broadcast %86 : i1 to vector<8x32xi1>
    %88 = vector.broadcast %87 : vector<8x32xi1> to vector<8x32xi1>
    %89 = arith.xori %85, %88 : vector<8x32xi1>
    %90 = arith.andi %89, %83 : vector<8x32xi1>
    %91 = vector.broadcast %79 : i32 to vector<8x32xi32>
    %92 = arith.addi %81, %91 : vector<8x32xi32>
    %93 = arith.select %90, %92, %81 : vector<8x32xi1>, vector<8x32xi32>
    %c0_i32_43 = arith.constant 0 : i32
    %94 = vector.broadcast %c0_i32_43 : i32 to vector<8x32xi32>
    %95 = arith.cmpi eq, %93, %94 : vector<8x32xi32>
    %96 = vector.broadcast %73 : f32 to vector<8x32xf32>
    %97 = vector.broadcast %76 : f32 to vector<8x32xf32>
    %98 = arith.select %95, %96, %97 : vector<8x32xi1>, vector<8x32xf32>
    %99 = arith.mulf %70, %98 : vector<8x32xf32>
    %cst_44 = arith.constant 0.000000e+00 : f32
    %100 = vector.broadcast %cst_44 : f32 to vector<8x94xf32>
    %101 = tpu.concatenate %99, %57, %65, %100 in 1 : vector<8x32xf32>, vector<8x1xf32>, vector<8x1xf32>, vector<8x94xf32> -> vector<8x128xf32>
    %c0_45 = arith.constant 0 : index
    %c0_46 = arith.constant 0 : index
    %c0_47 = arith.constant 0 : index
    %102 = vector.load %arg14[%c0_45, %c0_46, %c0_47] : memref<1x8x128xf32, #tpu.memory_space<vmem>>, vector<1x8x128xf32>
    %103 = vector.shape_cast %102 : vector<1x8x128xf32> to vector<8x128xf32>
    %104 = vector.shape_cast %101 : vector<8x128xf32> to vector<1x8x128xf32>
    tpu.vector_store %arg14[%c0_45, %c0_46, %c0_47], %104 {strides = array<i32>} : memref<1x8x128xf32, #tpu.memory_space<vmem>>, vector<1x8x128xf32>,
    return
  }
  func.func @transform_0(%arg0: i32, %arg1: memref<2x2xi32, #tpu.memory_space<smem>>) -> (i32, i32, i32) {
    %c0_i32 = arith.constant 0 : i32
    %c0_i32_0 = arith.constant 0 : i32
    %c0_i32_1 = arith.constant 0 : i32
    return %arg0, %c0_i32, %c0_i32_0 : i32, i32, i32
  }
  func.func @transform_1(%arg0: i32, %arg1: memref<2x2xi32, #tpu.memory_space<smem>>) -> (i32, i32) {
    %c0_i32 = arith.constant 0 : i32
    %c0_i32_0 = arith.constant 0 : i32
    %c0_i32_1 = arith.constant 0 : i32
    return %c0_i32, %c0_i32_0 : i32, i32
  }
  func.func @transform_2(%arg0: i32, %arg1: memref<2x2xi32, #tpu.memory_space<smem>>) -> (i32, i32) {
    %c0_i32 = arith.constant 0 : i32
    %c0_i32_0 = arith.constant 0 : i32
    %c0_i32_1 = arith.constant 0 : i32
    return %c0_i32, %c0_i32_0 : i32, i32
  }
  func.func @transform_3(%arg0: i32, %arg1: memref<2x2xi32, #tpu.memory_space<smem>>) -> (i32, i32) {
    %c0_i32 = arith.constant 0 : i32
    %c0_i32_0 = arith.constant 0 : i32
    %c0_i32_1 = arith.constant 0 : i32
    return %c0_i32, %c0_i32_0 : i32, i32
  }
  func.func @transform_4(%arg0: i32, %arg1: memref<2x2xi32, #tpu.memory_space<smem>>) -> (i32, i32) {
    %c0_i32 = arith.constant 0 : i32
    %c0_i32_0 = arith.constant 0 : i32
    %c0_i32_1 = arith.constant 0 : i32
    return %c0_i32, %c0_i32_0 : i32, i32
  }
  func.func @transform_5(%arg0: i32, %arg1: memref<2x2xi32, #tpu.memory_space<smem>>) -> (i32, i32) {
    %c0_i32 = arith.constant 0 : i32
    %c0_i32_0 = arith.constant 0 : i32
    %c0_i32_1 = arith.constant 0 : i32
    return %c0_i32, %c0_i32_0 : i32, i32
  }
  func.func @transform_6(%arg0: i32, %arg1: memref<2x2xi32, #tpu.memory_space<smem>>) -> (i32, i32) {
    %c0_i32 = arith.constant 0 : i32
    %c0_i32_0 = arith.constant 0 : i32
    %c0_i32_1 = arith.constant 0 : i32
    return %c0_i32, %c0_i32_0 : i32, i32
  }
  func.func @transform_7(%arg0: i32, %arg1: memref<2x2xi32, #tpu.memory_space<smem>>) -> (i32, i32) {
    %c0_i32 = arith.constant 0 : i32
    %c0_i32_0 = arith.constant 0 : i32
    %c0_i32_1 = arith.constant 0 : i32
    return %c0_i32, %c0_i32_0 : i32, i32
  }
  func.func @transform_8(%arg0: i32, %arg1: memref<2x2xi32, #tpu.memory_space<smem>>) -> (i32, i32) {
    %c0_i32 = arith.constant 0 : i32
    %c0_i32_0 = arith.constant 0 : i32
    %c0_i32_1 = arith.constant 0 : i32
    return %c0_i32, %c0_i32_0 : i32, i32
  }
  func.func @transform_9(%arg0: i32, %arg1: memref<2x2xi32, #tpu.memory_space<smem>>) -> (i32, i32) {
    %c0_i32 = arith.constant 0 : i32
    %c0_i32_0 = arith.constant 0 : i32
    %c0_i32_1 = arith.constant 0 : i32
    return %c0_i32, %c0_i32_0 : i32, i32
  }
  func.func @transform_10(%arg0: i32, %arg1: memref<2x2xi32, #tpu.memory_space<smem>>) -> (i32, i32) {
    %c0_i32 = arith.constant 0 : i32
    %c0_i32_0 = arith.constant 0 : i32
    %c0_i32_1 = arith.constant 0 : i32
    return %c0_i32, %c0_i32_0 : i32, i32
  }
  func.func @transform_11(%arg0: i32, %arg1: memref<2x2xi32, #tpu.memory_space<smem>>) -> (i32, i32) {
    %c0_i32 = arith.constant 0 : i32
    %c0_i32_0 = arith.constant 0 : i32
    %c0_i32_1 = arith.constant 0 : i32
    return %c0_i32, %c0_i32_0 : i32, i32
  }
  func.func @transform_12(%arg0: i32, %arg1: memref<2x2xi32, #tpu.memory_space<smem>>) -> (i32, i32, i32) {
    %c0_i32 = arith.constant 0 : i32
    %c0_i32_0 = arith.constant 0 : i32
    %c0_i32_1 = arith.constant 0 : i32
    return %arg0, %c0_i32, %c0_i32_0 : i32, i32, i32
  }
}

</mosaic_0001>

<bundles_post_ra>
// kernel: contourformer_forward.1
= control target key start
LH: loop header
LB: loop body
LE: loop exit
PB: predicated region body
PF: predicated region fallthrough
CT: control target
= control target key end

     0   :  { %s1845_s0 = inlined_call_operand.vmem [shape: s32[2,2], index: 0, kind: input, shape index: {}]   ;;  %s1846_s1 = inlined_call_operand.vmem [shape: f32[2,16,256], index: 1, kind: input, shape index: {}]   ;;  %s1847_s2 = inlined_call_operand.vmem [shape: f32[256,32], index: 2, kind: input, shape index: {}]   ;;  %s1848_s3 = inlined_call_operand.vmem [shape: f32[1,32], index: 3, kind: input, shape index: {}]   ;;  %s1849_s4 = inlined_call_operand.vmem [shape: f32[8,32], index: 4, kind: input, shape index: {}]   ;;  %s1850_s5 = inlined_call_operand.vmem [shape: f32[32,96], index: 5, kind: input, shape index: {}]   ;;  %s1851_s6 = inlined_call_operand.vmem [shape: f32[32,32], index: 6, kind: input, shape index: {}]   ;;  %s1852_s7 = inlined_call_operand.vmem [shape: f32[32,64], index: 7, kind: input, shape index: {}]   ;;  %s1853_s8 = inlined_call_operand.vmem [shape: f32[1,64], index: 8, kind: input, shape index: {}]   ;;  %s1854_s9 = inlined_call_operand.vmem [shape: f32[64,32], index: 9, kind: input, shape index: {}]   ;;  %s1855_s10 = inlined_call_operand.vmem [shape: f32[1,32], index: 10, kind: input, shape index: {}]   ;;  %s1856_s11 = inlined_call_operand.vmem [shape: f32[32,36], index: 11, kind: input, shape index: {}]   ;;  %s1857_s12 = inlined_call_operand.vmem [shape: f32[1,36], index: 12, kind: input, shape index: {}]   ;;  %s1858_s13 = inlined_call_operand.vmem [shape: f32[2,8,128], index: 13, kind: output, shape index: {}]  }
   0x1   :  { %s18_s27 = sshll.u32 %s1845_s0, 4  ;;  %s19_s27 = int_to_ptr.vmem [resolvable:$true] %s18_s27 }
   0x2   :  { %s1466_s28 = scalar_lea.vmem %s19_s27, 32  ;;  %p1471_p1 = scmp.lt.s32.totalorder %s19_s27, %s19_s27 }
   0x3   :  { %p1467_p0 = scmp.ne.s32.totalorder %s19_s27, %s1466_s28  ;;  %p1472_p2 = scmp.lt.s32.totalorder %s1466_s28, %s1466_s28 }
   0x5   :  { %p1473_p3 = por %p1472_p2, %p1471_p1 }
   0x7   :  { %p1474_p4 = pnand %p1473_p3, %p1467_p0 }
   0x9   :  { %1477 = shalt.err (!%p1474_p4)  }
   0xa   :  { %s1488_s29 = smov [#allocation3]  }
   0xb   :  { %21 = dma.vmem_to_smem %s19_s27, 32, %s1488_s29, [#allocation2] }
   0xc   :  { %1482 = dma.done.wait [#allocation2], 32 }
   0xd   :  { %1483 = vsyncadd [#allocation2], 4294967264 }
   0xe   :  { %23 = sfence }
   0xf   :  { %s1567_s30 = smov 0  }
  0x10 LB: > { %s1573_s0 = sadd.s32 4294967295, %s1486_s30   ;;  %p1262_p5 = scmp.ge.s32.totalorder %s1486_s30, 1  ;;  %s1486_s30 = sphi %s1567_s30, %s29_s30  }
  0x11   : > { %p369_p6 = scmp.lt.s32.totalorder %s1486_s30, 3 }
  0x13   : > { %p370_p7 = pnand %p1262_p5, %p369_p6 }
  0x14   : > { %p410_p8 = scmp.lt.s32.totalorder (!%p370_p7), %s1573_s0, 1  ;;  %s1491_s21 = smov (!%p370_p7), 96  }
  0x15   : > { %373 = sbr.rel (%p370_p7) target bundleno = 2524 (0x9dc), region = 68  ;;  %s1492_s23 = smov (!%p370_p7), 64  }
  0x16   : > { %s1282_s27 = sshll.u32 (!%p370_p7), %s1573_s0, 7 }
  0x17   : > { %s1179_s28 = sadd.s32 (!%p370_p7), 1, %s1282_s27  ;;  %s1177_s14 = sld [smem:[#allocation3 + %s1282_s27]] (!%p370_p7) }
  0x1a   : > { %v454_v0 = vld [vmem:[%s1847_s2 + $0xf8] sm:$0xff]  ;;  %v453_v2 = vld [vmem:[%s1847_s2 + $0xf0] sm:$0xff]  ;;  %v1489_v4 = vmov 0.0   ;;  %v452_v5 = vld [vmem:[%s1847_s2 + $0xe8] sm:$0xff]  ;;  %s1595_s24 = scalar_select %p410_p8, %s1573_s0, 1  ;;  %vm1490_vm0 = vmmov 0  }
  0x1b   : > { %v438_v1 = vld [vmem:[%s1847_s2 + $0x78] sm:$0xff]  ;;  %1286 = vmatprep.subr.mxu0 %v454_v0  ;;  %v437_v3 = vld [vmem:[%s1847_s2 + $0x70] sm:$0xff]  ;;  %1361 = vmatprep.subr.mxu1 %v1489_v4  ;;  %v436_v6 = vld [vmem:[%s1847_s2 + $0x68] sm:$0xff]  ;;  %vm542_vm1 = vcmask 261120   ;;  %vm716_vm2 = vcmask 130048   ;;  %vm985_vm3 = vcmask 523264  }
  0x1c   : > { %1287 = vmatpush3.msra.mxu0 %v438_v1  ;;  %v451_v7 = vld [vmem:[%s1847_s2 + $0xe0] sm:$0xff]  ;;  %s1285_s29 = sshll.u32 %s1595_s24, 5  ;;  %v450_v9 = vld [vmem:[%s1847_s2 + $0xd8] sm:$0xff]  ;;  %v449_v11 = vld [vmem:[%s1847_s2 + $0xd0] sm:$0xff]  ;;  %1369 = vmatprep.mubr.msk.f32.mxu1 %vm1490_vm0, %v1489_v4  ;;  %vm1150_vm4 = vcmask 294144   ;;  %s1265_s17 = sshll.u32 %s1595_s24, 3 }
  0x1d   : > { %1288 = vmatprep.subr.mxu0 %v453_v2  ;;  %v435_v8 = vld [vmem:[%s1847_s2 + $0x60] sm:$0xff]  ;;  %v434_v10 = vld [vmem:[%s1847_s2 + $0x58] sm:$0xff]  ;;  %s1616_s22 = scalar_lea.vmem %s1846_s1, %s1285_s29  ;;  %v433_v12 = vld [vmem:[%s1847_s2 + $0x50] sm:$0xff]  ;;  %s1180_s29 = sld [smem:[#allocation3 + %s1179_s28]]  ;;  %vm1200_vm8 = vcmask 269312   ;;  %vm1202_vm9 = vcmask 277504  }
  0x1e   : > { %1289 = vmatpush3.msra.mxu0 %v437_v3  ;;  %v448_v13 = vld [vmem:[%s1847_s2 + $0xc8] sm:$0xff]  ;;  %v447_v16 = vld [vmem:[%s1847_s2 + $0xc0] sm:$0xff]  ;;  %v541_v17 = vld [vmem:[%s1850_s5 + $0x18] sm:$0xff]  ;;  %s1178_s15 = scvt.s32.f32 %s1177_s14  ;;  %s418_s19 = scalar_lea.vmem %s1858_s13, %s1265_s17 }
  0x1f   : > { %1290 = vmatprep.subr.mxu0 %v452_v5  ;;  %v420_v14 = vld [vmem:[%s1616_s22 + $0x8] sm:$0xff]  ;;  %v540_v18 = vld [vmem:[%s1850_s5 + $0x10] sm:$0xff]  ;;  %v431_v19 = vld [vmem:[%s1847_s2 + $0x40] sm:$0xff]  ;;  %1362 = vmatpush3.msra.mxu1 %v541_v17 }
  0x20   : > { %1291 = vmatpush3.msra.mxu0 %v436_v6  ;;  %v432_v15 = vld [vmem:[%s1847_s2 + $0x48] sm:$0xff]  ;;  %526 = vmatprep.mubr.f32.mxu0 %v420_v14  ;;  %v446_v20 = vld [vmem:[%s1847_s2 + $0xb8] sm:$0xff]  ;;  %v445_v23 = vld [vmem:[%s1847_s2 + $0xb0] sm:$0xff] }
  0x21   : > { %1292 = vmatprep.subr.mxu0 %v451_v7  ;;  %1363 = vmatprep.subr.mxu1 %v1489_v4  ;;  %v539_v21 = vld [vmem:[%s1850_s5 + $0x8] sm:$0xff]  ;;  %v430_v22 = vld [vmem:[%s1847_s2 + $0x38] sm:$0xff]  ;;  %v429_v24 = vld [vmem:[%s1847_s2 + $0x30] sm:$0xff] }
  0x22   : > { %1293 = vmatpush3.msra.mxu0 %v435_v8  ;;  %1364 = vmatpush3.msra.mxu1 %v540_v18  ;;  %v444_v25 = vld [vmem:[%s1847_s2 + $0xa8] sm:$0xff]  ;;  %v443_v27 = vld [vmem:[%s1847_s2 + $0xa0] sm:$0xff]  ;;  %v442_v29 = vld [vmem:[%s1847_s2 + $0x98] sm:$0xff] }
  0x23   : > { %1294 = vmatprep.subr.mxu0 %v450_v9  ;;  %1365 = vmatprep.subr.mxu1 %v1489_v4  ;;  %v428_v26 = vld [vmem:[%s1847_s2 + $0x28] sm:$0xff]  ;;  %v427_v28 = vld [vmem:[%s1847_s2 + $0x20] sm:$0xff]  ;;  %v426_v30 = vld [vmem:[%s1847_s2 + $0x18] sm:$0xff]  ;;  %s1181_s16 = scvt.s32.f32 %s1180_s29 }
  0x24   : > { %1295 = vmatpush3.msra.mxu0 %v434_v10  ;;  %1366 = vmatpush3.msra.mxu1 %v539_v21  ;;  %v441_v31 = vld [vmem:[%s1847_s2 + $0x90] sm:$0xff]  ;;  %v440_v33 = vld [vmem:[%s1847_s2 + $0x88] sm:$0xff]  ;;  %v439_v35 = vld [vmem:[%s1847_s2 + $0x80] sm:$0xff] }
  0x25   : > { %1296 = vmatprep.subr.mxu0 %v449_v11  ;;  %1367 = vmatprep.subr.mxu1 %v1489_v4  ;;  %v425_v32 = vld [vmem:[%s1847_s2 + $0x10] sm:$0xff]  ;;  %v424_v34 = vld [vmem:[%s1847_s2 + $0x8] sm:$0xff]  ;;  %v423_v36 = vld [vmem:[%s1847_s2] sm:$0xff] }
  0x26   : > { %1297 = vmatpush3.msra.mxu0 %v433_v12  ;;  %v419_v37 = vld [vmem:[%s1616_s22] sm:$0xff]  ;;  %v422_v38 = vld [vmem:[%s1616_s22 + $0x18] sm:$0xff]  ;;  %v421_v39 = vld [vmem:[%s1616_s22 + $0x10] sm:$0xff] }
  0x27   : > { %1298 = vmatprep.subr.mxu0 %v448_v13  ;;  %v538_v40 = vld [vmem:[%s1850_s5] sm:$0xff]  ;;  %v810_v10 = vld [vmem:[%s1851_s6 + $0x18] sm:$0xff]  ;;  %v809_v11 = vld [vmem:[%s1851_s6 + $0x10] sm:$0xff] }
  0x28   : > { %1299 = vmatpush3.msra.mxu0 %v432_v15  ;;  %1368 = vmatpush3.msra.mxu1 %v538_v40  ;;  %v1709_v41 = vld [vmem:[%s1849_s4] sm:$0xff]  ;;  %v808_v12 = vld [vmem:[%s1851_s6 + $0x8] sm:$0xff]  ;;  %v888_v14 = vld [vmem:[%s1852_s7 + $0x18] sm:$0xff] }
  0x29   : > { %1300 = vmatprep.subr.mxu0 %v447_v16  ;;  %1370 = vmatmul.mubr.msk.f32.vlgmr.msra.gmra.mxu1 %vm542_vm1, %v1709_v41  ;;  %v1266_v43 = vld [vmem:[%s1848_s3] ss:$0 sm:$0xff]  ;;  %v887_v15 = vld [vmem:[%s1852_s7 + $0x10] sm:$0xff]  ;;  %v886_v18 = vld [vmem:[%s1852_s7 + $0x8] sm:$0xff] }
  0x2a   : > { %1301 = vmatpush3.msra.mxu0 %v431_v19  ;;  %1378 = vmatprep.subr.mxu1 %v1489_v4  ;;  %v807_v13 = vld [vmem:[%s1851_s6] sm:$0xff]  ;;  %v976_v21 = vld [vmem:[%s1854_s9 + $0x30] sm:$0xff] }
  0x2b   : > { %1302 = vmatprep.subr.mxu0 %v446_v20  ;;  %1372 = vmatprep.mubr.msk.f32.mxu1 %vm1490_vm0, %v1489_v4  ;;  %v885_v19 = vld [vmem:[%s1852_s7] sm:$0xff]  ;;  %v977_v20 = vld [vmem:[%s1854_s9 + $0x38] sm:$0xff] }
  0x2c   : > { %1303 = vmatpush3.msra.mxu0 %v430_v22  ;;  %v975_v22 = vld [vmem:[%s1854_s9 + $0x28] sm:$0xff]  ;;  %v1277_v40 = vld [vmem:[%s1855_s10] ss:$0 sm:$0xff] }
  0x2d   : > { %1304 = vmatprep.subr.mxu0 %v445_v23  ;;  %v974_v23 = vld [vmem:[%s1854_s9 + $0x20] sm:$0xff] }
  0x2e   : > { %1305 = vmatpush3.msra.mxu0 %v429_v24  ;;  %v973_v24 = vld [vmem:[%s1854_s9 + $0x18] sm:$0xff] }
  0x2f   : > { %1306 = vmatprep.subr.mxu0 %v444_v25 }
  0x30   : > { %1307 = vmatpush3.msra.mxu0 %v428_v26 }
  0x31   : > { %1308 = vmatprep.subr.mxu0 %v443_v27 }
  0x32   : > { %1309 = vmatpush3.msra.mxu0 %v427_v28  ;;  %v972_v28 = vld [vmem:[%s1854_s9 + $0x10] sm:$0xff] }
  0x33   : > { %1310 = vmatprep.subr.mxu0 %v442_v29  ;;  %v971_v29 = vld [vmem:[%s1854_s9 + $0x8] sm:$0xff] }
  0x34   : > { %1311 = vmatpush3.msra.mxu0 %v426_v30  ;;  %v970_v30 = vld [vmem:[%s1854_s9] sm:$0xff] }
  0x35   : > { %1312 = vmatprep.subr.mxu0 %v441_v31  ;;  %v1063_v31 = vld [vmem:[%s1856_s11 + $0x18] sm:$0xff] }
  0x36   : > { %1313 = vmatpush3.msra.mxu0 %v425_v32  ;;  %v1275_v32 = vld [vmem:[%s1853_s8] ss:$0 sm:$0xff] }
  0x37   : > { %1314 = vmatprep.subr.mxu0 %v440_v33 }
  0x38   : > { %1315 = vmatpush3.msra.mxu0 %v424_v34 }
  0x39   : > { %1316 = vmatprep.subr.mxu0 %v439_v35 }
  0x3a   : > { %1317 = vmatpush3.msra.mxu0 %v423_v36 }
  0x3b   : > { %527 = vmatmul.mubr.f32.vlgmr.msra.gmra.mxu0 %v419_v37  ;;  %1403 = vmatprep.subr.mxu0 %v1489_v4  ;;  %v1062_v37 = vld [vmem:[%s1856_s11 + $0x10] sm:$0xff] }
  0x3c   : > { %531 = vmatprep.mubr.f32.mxu0 %v422_v38  ;;  %1404 = vmatpush3.msra.mxu0 %v888_v14  ;;  %v1061_v38 = vld [vmem:[%s1856_s11 + $0x8] sm:$0xff] }
  0x3d   : > { %1405 = vmatprep.subr.mxu0 %v1489_v4 }
  0x3e   : > { %1406 = vmatpush3.msra.mxu0 %v887_v15 }
  0x3f   : > { %532 = vmatmul.mubr.f32.gmra.mxu0 %v421_v39  ;;  %1407 = vmatprep.subr.mxu0 %v1489_v4  ;;  %v1060_v39 = vld [vmem:[%s1856_s11] sm:$0xff] }
  0x40   : > { %1411 = vmatprep.mubr.msk.f32.mxu0 %vm1490_vm0, %v1489_v4  ;;  %1408 = vmatpush3.msra.mxu0 %v886_v18 }
  0x41   : > { %1409 = vmatprep.subr.mxu0 %v1489_v4 }
  0x42   : > { %1410 = vmatpush3.msra.mxu0 %v885_v19 }
  0x43   : > { %1433 = vmatprep.subr.mxu0 %v1489_v4 }
  0xe9   : > { %v618_v51 = vpop.f32.mrf.mxu1 }
  0xea   : > { %v632_v59 = vmul.f32 0.17677669, %v618_v51 }
  0xeb   : > { %v1371_v52 = vpop.f32.mrf.mxu1 }
  0xfb   : > { %v1318_v42 = vpop.f32.mrf.mxu0 }
  0xfd   : > { %v1319_v44 = vpop.f32.mrf.mxu0 }
  0xfe   : > { %v1320_v45 = vadd.f32 %v1319_v44, %v1318_v42 }
  0xff   : > { %v1321_v46 = vpop.f32.mrf.mxu0 }
 0x100   : > { %v529_v47 = vadd.f32 %v1320_v45, %v1266_v43  ;;  %v1154_v45 = vlaneseq }
 0x101   : > { %v1322_v48 = vpop.f32.mrf.mxu0 }
 0x102   : > { %v1323_v49 = vadd.f32 %v1322_v48, %v1321_v46  ;;  %1373 = vmatmul.mubr.msk.f32.gmra.mxu1 %vm542_vm1, %v529_v47  ;;  %v1155_v46 = vand.u32 127, %v1154_v45 }
 0x103   : > { %1375 = vmatprep.mubr.msk.f32.mxu1 %vm1490_vm0, %v1489_v4 }
 0x104   : > { %v534_v50 = vadd.f32 %v1323_v49, %v1266_v43 }
 0x106   : > { %1376 = vmatmul.mubr.msk.f32.gmra.mxu1 %vm542_vm1, %v534_v50 }
 0x107   : > { %1382 = vmatprep.mubr.msk.f32.mxu1 %vm1490_vm0, %v1489_v4 }
 0x1c2   : > { %v623_v53 = vpop.f32.mrf.mxu1 }
 0x1c4   : > { %v1374_v54 = vpop.f32.mrf.mxu1 }
 0x1c6   : > { %v628_v55 = vpop.f32.mrf.mxu1 }
 0x1c7   : > { %637 = vrot.lane.b32.xlu0 %v628_v55, %s1491_s21 }
 0x1c8   : > { %v1377_v56 = vpop.f32.mrf.mxu1 }
 0x1cb   : > { %635 = vrot.lane.b32.xlu0 %v623_v53, %s1491_s21 }
 0x1cf   : > { %730 = vrot.lane.b32.xlu0 %v628_v55, %s1492_s23 }
 0x239   : > { %v638_v57 = vpop.permute.xlu0 %637 }
 0x23a   : > { %1379 = vmatpush3.xpose.msk.msra.mxu1 %vm542_vm1, %v638_v57 }
 0x23b   : > { %1380 = vmatprep.subr.mxu1 %v1489_v4 }
 0x23d   : > { %v636_v58 = vpop.permute.xlu0 %635 }
 0x23e   : > { %1381 = vmatpush3.xpose.msk.msra.mxu1 %vm542_vm1, %v636_v58 }
 0x23f   : > { %1385 = vmatprep.subr.mxu1 %v1489_v4 }
 0x241   : > { %1383 = vmatmul.mubr.msk.f32.vlgmr.msra.gmra.mxu1 %vm542_vm1, %v632_v59  ;;  %v731_v60 = vpop.permute.xlu0 %730 }
 0x242   : > { %1386 = vmatpush3.msra.mxu1 %v731_v60  ;;  %1389 = vmatprep.mubr.msk.f32.mxu1 %vm1490_vm0, %v1489_v4 }
 0x243   : > { %1387 = vmatprep.subr.mxu1 %v1489_v4 }
 0x301   : > { %v712_v61 = vpop.f32.mrf.mxu1 }
 0x302   : > { %v717_v62 = vsel %vm716_vm2, %v712_v61, -inf }
 0x303   : > { %718 = vmax.xlane.f32.xlu1 %v717_v62  ;;  %v1384_v63 = vpop.f32.mrf.mxu1 }
 0x38c   : > { %v719_v0 = vpop.xlane.xlu1 %718 }
 0x38d   : > { %v720_v1 = vsub.f32 %v712_v61, %v719_v0 }
 0x38f   : > { %v721_v2 = vmul.f32 1.442695, %v720_v1  ;;  %v1186_v1 = vand.u32 1, %v1155_v46 }
 0x391   : > { %1458 = vpow2.f32 %v721_v2  ;;  %vm1194_vm7 = vcmp.eq.s32.totalorder %v1186_v1, 0 }
 0x39e   : > { %v1459_v3 = vpop.eup %1458 }
 0x39f   : > { %v723_v5 = vsel %vm716_vm2, %v1459_v3, 0.0 }
 0x3a0   : > { %724 = vadd.xlane.f32.xlu1 %v723_v5  ;;  %v1196_v5 = vstv %s1181_s16 }
 0x3b1   : > { %728 = vrot.lane.b32.xlu1 %v623_v53, %s1492_s23  ;;  %s1493_s23 = smov 32  }
 0x3b5   : > { %1157 = vrot.lane.b32.xlu1 %v1155_v46, %s1493_s23 }
 0x429   : > { %v725_v6 = vpop.xlane.xlu1 %724 }
 0x42a   : > { %1460 = vrcp.f32 %v725_v6 }
 0x42d   : > { %v729_v7 = vpop.permute.xlu1 %728 }
 0x42e   : > { %1388 = vmatpush3.msra.mxu1 %v729_v7 }
 0x42f   : > { %1392 = vmatprep.subr.mxu1 %v1489_v4 }
 0x431   : > { %v1158_v55 = vpop.permute.xlu1 %1157 }
 0x437   : > { %v1461_v8 = vpop.eup %1460 }
 0x438   : > { %v727_v9 = vmul.f32 %v1461_v8, %v1459_v3  ;;  %v1195_v3 = vstv %s1178_s15 }
 0x439   : > { %v1197_v7 = vsel %vm1194_vm7, %v1195_v3, %v1196_v5 }
 0x43a   : > { %1390 = vmatmul.mubr.msk.f32.vlgmr.msra.gmra.mxu1 %vm716_vm2, %v727_v9 }
 0x43b   : > { %1393 = vmatpush3.msra.mxu1 %v810_v10  ;;  %1400 = vmatprep.mubr.msk.f32.mxu1 %vm1490_vm0, %v1489_v4 }
 0x43c   : > { %1394 = vmatprep.subr.mxu1 %v1489_v4 }
 0x43d   : > { %1395 = vmatpush3.msra.mxu1 %v809_v11 }
 0x43e   : > { %1396 = vmatprep.subr.mxu1 %v1489_v4 }
 0x43f   : > { %1397 = vmatpush3.msra.mxu1 %v808_v12 }
 0x440   : > { %1398 = vmatprep.subr.mxu1 %v1489_v4 }
 0x441   : > { %1399 = vmatpush3.msra.mxu1 %v807_v13 }
 0x442   : > { %1414 = vmatprep.subr.mxu1 %v1489_v4 }
 0x4fa   : > { %v803_v16 = vpop.f32.mrf.mxu1 }
 0x4fb   : > { %1401 = vmatmul.mubr.msk.f32.vlgmr.msra.gmra.mxu1 %vm542_vm1, %v803_v16 }
 0x4fc   : > { %v1391_v17 = vpop.f32.mrf.mxu1  ;;  %1430 = vmatprep.mubr.msk.f32.mxu1 %vm1490_vm0, %v1489_v4  ;;  %1415 = vmatpush3.msra.mxu1 %v977_v20 }
 0x4fd   : > { %1416 = vmatprep.subr.mxu1 %v1489_v4 }
 0x4fe   : > { %1417 = vmatpush3.msra.mxu1 %v976_v21 }
 0x4ff   : > { %1418 = vmatprep.subr.mxu1 %v1489_v4 }
 0x500   : > { %1419 = vmatpush3.msra.mxu1 %v975_v22 }
 0x501   : > { %1420 = vmatprep.subr.mxu1 %v1489_v4 }
 0x502   : > { %1421 = vmatpush3.msra.mxu1 %v974_v23 }
 0x503   : > { %1422 = vmatprep.subr.mxu1 %v1489_v4 }
 0x504   : > { %1423 = vmatpush3.msra.mxu1 %v973_v24 }
 0x505   : > { %1424 = vmatprep.subr.mxu1 %v1489_v4 }
 0x506   : > { %1425 = vmatpush3.msra.mxu1 %v972_v28 }
 0x507   : > { %1426 = vmatprep.subr.mxu1 %v1489_v4 }
 0x508   : > { %1427 = vmatpush3.msra.mxu1 %v971_v29 }
 0x509   : > { %1428 = vmatprep.subr.mxu1 %v1489_v4 }
 0x50a   : > { %1429 = vmatpush3.msra.mxu1 %v970_v30 }
 0x5bb   : > { %v880_v25 = vpop.f32.mrf.mxu1 }
 0x5bc   : > { %v884_v26 = vadd.f32 %v880_v25, %v1709_v41 }
 0x5bd   : > { %v1402_v27 = vpop.f32.mrf.mxu1 }
 0x5be   : > { %1412 = vmatmul.mubr.msk.f32.vlgmr.msra.gmra.mxu0 %vm542_vm1, %v884_v26 }
 0x5bf   : > { %1441 = vmatprep.mubr.msk.f32.mxu0 %vm1490_vm0, %v1489_v4  ;;  %1434 = vmatpush3.msra.mxu0 %v1063_v31 }
 0x5c0   : > { %1435 = vmatprep.subr.mxu0 %v1489_v4 }
 0x5c1   : > { %1436 = vmatpush3.msra.mxu0 %v1062_v37 }
 0x5c2   : > { %1437 = vmatprep.subr.mxu0 %v1489_v4 }
 0x5c3   : > { %1438 = vmatpush3.msra.mxu0 %v1061_v38 }
 0x5c4   : > { %1439 = vmatprep.subr.mxu0 %v1489_v4  ;;  %v1279_v4 = vld [vmem:[%s1857_s12] ss:$0 sm:$0xff] }
 0x5c5   : > { %1440 = vmatpush3.msra.mxu0 %v1060_v39 }
 0x67e   : > { %v965_v33 = vpop.f32.mrf.mxu0 }
 0x67f   : > { %v966_v34 = vadd.f32 %v1275_v32, %v965_v33 }
 0x680   : > { %v1413_v35 = vpop.f32.mrf.mxu0 }
 0x681   : > { %v969_v36 = vmax.f32 %v966_v34, 0.0 }
 0x683   : > { %1431 = vmatmul.mubr.msk.f32.vlgmr.msra.gmra.mxu1 %vm985_vm3, %v969_v36 }
 0x743   : > { %v1055_v41 = vpop.f32.mrf.mxu1 }
 0x744   : > { %v1056_v42 = vadd.f32 %v1277_v40, %v1055_v41 }
 0x745   : > { %v1432_v43 = vpop.f32.mrf.mxu1 }
 0x746   : > { %v1059_v44 = vadd.f32 %v1056_v42, %v884_v26 }
 0x748   : > { %1442 = vmatmul.mubr.msk.f32.vlgmr.msra.gmra.mxu0 %vm542_vm1, %v1059_v44 }
 0x808   : > { %v1140_v47 = vpop.f32.mrf.mxu0 }
 0x809   : > { %v1141_v48 = vadd.f32 %v1279_v4, %v1140_v47 }
 0x80a   : > { %v1443_v49 = vpop.f32.mrf.mxu0 }
 0x80b   : > { %v1281_v50 = vmul.f32 -1.442695, %v1141_v48 }
 0x80d   : > { %1462 = vpow2.f32 %v1281_v50 }
 0x81a   : > { %v1463_v51 = vpop.eup %1462 }
 0x81b   : > { %v1147_v52 = vadd.f32 1.0, %v1463_v51 }
 0x81d   : > { %1464 = vrcp.f32 %v1147_v52 }
 0x82a   : > { %v1465_v53 = vpop.eup %1464 }
 0x82b   : > { %v1151_v54 = vsel %vm1150_vm4, %v1465_v53, -inf  ;;  %v1198_v11 = vmul.f32 %v1465_v53, %v1197_v7 }
 0x82c   : > { %1152 = vmax.xlane.f32.xlu0 %v1151_v54 }
 0x8b5   : > { %v1153_v56 = vpop.xlane.xlu0 %1152 }
 0x8b6   : > { %vm1156_vm5 = vcmp.ge.f32.partialorder %v1465_v53, %v1153_v56  ;;  %v1199_v13 = vsel %vm542_vm1, %v1198_v11, %v1153_v56 }
 0x8b7   : > { %v1159_v57 = vsel %vm1156_vm5, %v1158_v55, 4 }
 0x8b8   : > { %v1160_v58 = vsel %vm1150_vm4, %v1159_v57, 2147483647 }
 0x8b9   : > { %v1162_v59 = vshra.s32 %v1160_v58, 16  ;;  %v1161_v61 = vand.u32 65535, %v1160_v58 }
 0x8bb   : > { %v1164_v60 = vcvt.s32.f32 %v1162_v59  ;;  %v1163_v63 = vcvt.s32.f32 %v1161_v61 }
 0x8bd   : > { %1165 = vmin.xlane.f32.xlu1 %v1164_v60 }
 0x946   : > { %v1166_v62 = vpop.xlane.xlu1 %1165 }
 0x947   : > { %vm1167_vm6 = vcmp.eq.f32.partialorder %v1164_v60, %v1166_v62  ;;  %v1172_v2 = vcvt.f32.s32 %v1166_v62 }
 0x948   : > { %v1168_v0 = vsel %vm1167_vm6, %v1163_v63, inf }
 0x949   : > { %1169 = vmin.xlane.f32.xlu0 %v1168_v0  ;;  %v1173_v8 = vshll.u32 %v1172_v2, 16 }
 0x9d2   : > { %v1170_v6 = vpop.xlane.xlu0 %1169 }
 0x9d3   : > { %v1171_v9 = vcvt.f32.s32 %v1170_v6 }
 0x9d5   : > { %v1174_v10 = vadd.s32 %v1173_v8, %v1171_v9 }
 0x9d7   : > { %v1175_v12 = vcvt.s32.f32 %v1174_v10 }
 0x9d9   : > { %v1201_v14 = vsel %vm1200_vm8, %v1199_v13, %v1175_v12 }
 0x9da   : > { %v1203_v15 = vsel %vm1202_vm9, %v1201_v14, 0.0 }
 0x9db   : > { %1204 = vst [vmem:[%s418_s19] sm:$0xff] %v1203_v15 }
 0x9dc PF: > { %s29_s30 = sadd.s32 1, %s1486_s30  }
 0x9dd   : > { %p26_p9 = scmp.ge.s32.totalorder %s29_s30, 4  }
 0x9df   :  { %28 = sbr.rel (!%p26_p9) target bundleno = 16 (0x10), region = 98 }

</bundles_post_ra>
